<compile_context>
chip_gen: v6e
topology: v6e:2x2x1
jax: 0.10.0
libtpu: 0.0.40
codegen_flags: <defaults>
</compile_context>

<pallas_src>
import functools

import jax
import jax.numpy as jnp
from jax.experimental import pallas as pl
from jax.experimental.pallas import tpu as pltpu


def _round_up(a, b):
    return (a + b - 1) // b * b


def _downsample_kernel(x_ref, o_ref, *, stride, exact_f32):
    # x_ref: (TR, K) with K == W (row-skip path) or K == s*W (fallback path).
    # o_ref: (TR, W_out);  out[:, wo] = x[:, stride*wo].
    x = x_ref[...]
    k = x.shape[-1]
    w_out = o_ref.shape[-1]
    kk = jax.lax.broadcasted_iota(jnp.int32, (k, w_out), 0)
    ww = jax.lax.broadcasted_iota(jnp.int32, (k, w_out), 1)
    hit = kk == stride * ww                      # one-hot column selector (VPU filler)
    if exact_f32:
        # f32/f16: exact 0/1 gather via f32 MXU path.
        y = jnp.dot(x.astype(jnp.float32), hit.astype(jnp.float32),
                    precision=jax.lax.Precision.HIGHEST,
                    preferred_element_type=jnp.float32)
    else:
        # bf16 x {0,1} with f32 accumulation is already bit-exact.
        y = jnp.dot(x, hit.astype(x.dtype), preferred_element_type=jnp.float32)
    o_ref[...] = y.astype(o_ref.dtype)


def _vmem_capacity_bytes():
    try:
        cap = int(pltpu.get_tpu_info().vmem_capacity_bytes)
        if cap > 0:
            return cap
    except Exception:
        pass
    return 64 << 20        # conservative: v7x has 64 MiB per TensorCore


def _pick_row_tile(nrows, k, w_out, dtype, budget_bytes, min_steps=4):
    """Largest sublane-aligned row tile whose pipelined VMEM footprint
    (2x in block + 2x out block + f32 temporaries + selector) fits the budget,
    capped so the grid keeps >= min_steps steps when there is enough work."""
    item = jnp.dtype(dtype).itemsize
    sub = 8 * max(1, 4 // item)          # sublane packing: 8 f32, 16 bf16, 32 int8
    kp = _round_up(k, 128)
    wop = _round_up(w_out, 128)
    per_row = 2 * kp * item + 2 * wop * item + 4 * kp + 4 * wop
    fixed = 4 * kp * wop                 # selector + matmul temporaries (f32)
    avail = max(budget_bytes - fixed, per_row * sub)
    tr = max(sub, (avail // per_row) // sub * sub)
    tr = min(tr, _round_up(nrows, sub))
    if nrows > min_steps * sub:
        # Keep multiple grid steps: v7x shards "parallel" axes over its 2 TCs
        # and the pipeline needs something to overlap.
        tr = min(tr, max(sub, (pl.cdiv(nrows, min_steps) // sub) * sub))
    return int(tr)


_TINY_FALLBACK_ELEMS = 1 << 15           # below this, pallas_call overhead dominates


def downsample_forward(x, scale_factor=2, mode="nearest", *, force_pallas=False):
    """Pallas TPU implementation of DownSample.forward for an NCHW tensor."""
    if mode != "nearest":
        # TODO(synk): only mode='nearest' is implemented (bilinear etc. need weights).
        raise NotImplementedError("only mode='nearest' is supported")
    s = int(scale_factor)
    if float(s) != float(scale_factor) or s < 1:
        # TODO(synk): non-integer scale factors are not implemented.
        raise NotImplementedError("only integer scale factors are supported")
    if s == 1:
        return x

    N, C, H, W = x.shape
    assert H % s == 0 and W % s == 0, "spatial dims must be divisible by scale_factor"
    h_out, w_out = H // s, W // s
    nrows = N * C * h_out

    if not force_pallas and x.size <= _TINY_FALLBACK_ELEMS:
        # Fixed pallas_call / pipeline overhead dominates for tiny tensors.
        return x[:, :, ::s, ::s]

    # Free contiguous reshape: row r = ((n*C + c)*h_out + ho), lane j = i*W + w
    # (h = ho*s + i).  The wanted sample (i=0, w=s*wo) is lane s*wo, i.e. it
    # lives inside the first W lanes of each row.
    x2d = x.reshape(nrows, s * W)

    # Row skip: fetch only the first W lanes (the i == 0 source row) when that
    # block is lane-aligned; otherwise fetch the full s*W lanes (always legal).
    k = W if W % 128 == 0 else s * W

    cap = _vmem_capacity_bytes()
    vmem_limit = int(min(max(cap - (16 << 20), 32 << 20), 96 << 20))
    block_budget = min(vmem_limit - (8 << 20), 32 << 20)   # safe on all generations
    tr = _pick_row_tile(nrows, k, w_out, x.dtype, block_budget)

    kernel = functools.partial(
        _downsample_kernel, stride=s, exact_f32=(x.dtype != jnp.bfloat16))

    out2d = pl.pallas_call(
        kernel,
        out_shape=jax.ShapeDtypeStruct((nrows, w_out), x.dtype),
        grid=(pl.cdiv(nrows, tr),),
        in_specs=[pl.BlockSpec((tr, k), lambda t: (t, 0))],
        out_specs=pl.BlockSpec((tr, w_out), lambda t: (t, 0)),
        compiler_params=pltpu.CompilerParams(
            dimension_semantics=("parallel",),
            vmem_limit_bytes=vmem_limit,
        ),
    )(x2d)

    return out2d.reshape(N, C, h_out, w_out)


def _nearest_downsample_ref(x, s):
    # F.interpolate(mode='nearest', scale=1/s): src_idx = floor(dst * s) = s*dst
    return x[:, :, ::s, ::s]


if __name__ == "__main__":
    key = jax.random.PRNGKey(0)
    k0, k1, k2, k3 = jax.random.split(key, 4)

    # 1) Primary DownSample(scale_factor=2) case (unaligned W -> full-lane path).
    x = jax.random.normal(k0, (2, 4, 16, 16), jnp.float32)
    out = jax.block_until_ready(downsample_forward(x, scale_factor=2, force_pallas=True))
    ref = _nearest_downsample_ref(x, 2)
    assert out.shape == (2, 4, 8, 8), out.shape
    err = float(jnp.max(jnp.abs(out - ref)))
    assert err <= 1e-6, f"max abs err {err}"

    # 2) Non-square / odd channel count, partial row tile.
    x2 = jax.random.normal(k1, (1, 3, 8, 12), jnp.float32)
    out2 = jax.block_until_ready(downsample_forward(x2, scale_factor=2, force_pallas=True))
    ref2 = _nearest_downsample_ref(x2, 2)
    assert out2.shape == (1, 3, 4, 6), out2.shape
    err2 = float(jnp.max(jnp.abs(out2 - ref2)))
    assert err2 <= 1e-6, f"max abs err {err2}"

    # 3) Lane-aligned W (row-skip DMA path), multi-step parallel grid, f32.
    x3 = jax.random.normal(k2, (2, 8, 32, 128), jnp.float32)
    out3 = jax.block_until_ready(downsample_forward(x3, scale_factor=2))
    ref3 = _nearest_downsample_ref(x3, 2)
    assert out3.shape == (2, 8, 16, 64), out3.shape
    err3 = float(jnp.max(jnp.abs(out3 - ref3)))
    assert err3 <= 1e-6, f"max abs err {err3}"

    # 4) bf16 input, scale_factor=4, row-skip path, native MXU precision.
    x4 = jax.random.normal(k3, (1, 4, 16, 256), jnp.bfloat16)
    out4 = jax.block_until_ready(downsample_forward(x4, scale_factor=4, force_pallas=True))
    ref4 = _nearest_downsample_ref(x4, 4)
    assert out4.shape == (1, 4, 4, 64), out4.shape
    err4 = float(jnp.max(jnp.abs((out4 - ref4).astype(jnp.float32))))
    assert err4 <= 1e-6, f"max abs err {err4}"

    print("KERNEL_OK")
</pallas_src>

<mosaic_0001>
module attributes {stable_mosaic.version = 11 : i64} {
  func.func @_downsample_kernel(%arg0: i32, %arg1: memref<16x32xf32, #tpu.memory_space<vmem>>, %arg2: memref<16x8xf32, #tpu.memory_space<vmem>>) attributes {dimension_semantics = [#tpu.dimension_semantics<parallel>], iteration_bounds = array<i64: 4>, scalar_prefetch = 0 : i64, scratch_operands = 0 : i64, tpu.core_type = #tpu.core_type<tc>, window_params = [{transform_indices = @transform_0, window_bounds = array<i64: 16, 32>}, {transform_indices = @transform_1, window_bounds = array<i64: 16, 8>}]} {
    %c0 = arith.constant 0 : index
    %c0_0 = arith.constant 0 : index
    %0 = vector.load %arg1[%c0, %c0_0] : memref<16x32xf32, #tpu.memory_space<vmem>>, vector<16x32xf32>
    %1 = tpu.iota {dimensions = array<i32: 0>} : vector<32x8xi32>
    %2 = tpu.iota {dimensions = array<i32: 1>} : vector<32x8xi32>
    %c2_i32 = arith.constant 2 : i32
    %3 = vector.broadcast %c2_i32 : i32 to vector<32x8xi32>
    %4 = arith.muli %3, %2 : vector<32x8xi32>
    %5 = arith.cmpi eq, %1, %4 : vector<32x8xi32>
    %6 = arith.extui %5 : vector<32x8xi1> to vector<32x8xi32>
    %7 = arith.sitofp %6 : vector<32x8xi32> to vector<32x8xf32>
    %cst = arith.constant dense<0.000000e+00> : vector<16x8xf32>
    %8 = tpu.matmul %0, %7, %cst {dimension_numbers = #tpu.dot_dimension_numbers<[1], [0], [0], [1], [0, 0, 1, 1], [], []>, precision = #tpu.contract_precision<fp32>} : vector<16x32xf32>, vector<32x8xf32>, vector<16x8xf32> -> vector<16x8xf32>
    %c0_1 = arith.constant 0 : index
    %c0_2 = arith.constant 0 : index
    %9 = vector.load %arg2[%c0_1, %c0_2] : memref<16x8xf32, #tpu.memory_space<vmem>>, vector<16x8xf32>
    tpu.vector_store %arg2[%c0_1, %c0_2], %8 {strides = array<i32>} : memref<16x8xf32, #tpu.memory_space<vmem>>, vector<16x8xf32>,
    return
  }
  func.func @transform_0(%arg0: i32) -> (i32, i32) {
    %c0_i32 = arith.constant 0 : i32
    %c0_i32_0 = arith.constant 0 : i32
    return %arg0, %c0_i32 : i32, i32
  }
  func.func @transform_1(%arg0: i32) -> (i32, i32) {
    %c0_i32 = arith.constant 0 : i32
    %c0_i32_0 = arith.constant 0 : i32
    return %arg0, %c0_i32 : i32, i32
  }
}

</mosaic_0001>

<bundles_post_ra>
// kernel: tpu_custom_call.1
= control target key start
LH: loop header
LB: loop body
LE: loop exit
PB: predicated region body
PF: predicated region fallthrough
CT: control target
= control target key end

     0   :  { %s895_s6 = smov 0   ;;  %s1029_s0 = inlined_call_operand.vmem [shape: f32[64,32], index: 0, kind: input, shape index: {}]   ;;  %s1030_s1 = inlined_call_operand.vmem [shape: f32[64,8], index: 1, kind: output, shape index: {}]  }
   0x1 LB: > { %s736_s7 = sadd.s32 4294967295, %s881_s6   ;;  %p740_p0 = scmp.ge.s32.totalorder %s881_s6, 1  ;;  %s881_s6 = sphi %s895_s6, %s11_s6  }
   0x2   : > { %p88_p1 = scmp.lt.s32.totalorder %s881_s6, 5 }
   0x4   : > { %p89_p2 = pnand %p740_p0, %p88_p1 }
   0x5   : > { %s741_s8 = sshll.u32 (!%p89_p2), %s736_s7, 1 }
   0x6   : > { %92 = sbr.rel (%p89_p2) target bundleno = 252 (0xfc), region = 24  ;;  %p109_p3 = scmp.lt.s32.totalorder (!%p89_p2), %s741_s8, 7 }
   0xb   : > { %v122_v0 = vlaneseq  ;;  %s1040_s8 = smov (!%p109_p3, %s741_s8), 7  ;;  %vm142_vm0 = vcmask 261120   ;;  %v883_v11 = vmov 1.0   ;;  %v884_v12 = vmov 0.0  }
   0xc   : > { %s742_s9 = sshll.u32 %s1040_s8, 3  ;;  %vm677_vm5 = vcmask 64512  }
   0xd   : > { %v123_v1 = vshrl.u32 %v122_v0, 7  ;;  %v128_v2 = vand.u32 127, %v122_v0  ;;  %s112_s12 = scalar_lea.vmem %s1029_s0, %s742_s9  ;;  %s118_s15 = scalar_lea.vmem %s1030_s1, %s742_s9 }
   0xe   : > { %v120_v15 = vld [vmem:[%s112_s12] sm:$0xff]  ;;  %v121_v16 = vld [vmem:[%s112_s12 + $0x8] sm:$0xff] }
   0xf   : > { %v126_v3 = vadd.s32 24, %v123_v1  ;;  %v129_v4 = vmul.u32 2, %v128_v2  ;;  %v125_v5 = vadd.s32 16, %v123_v1  ;;  %v124_v6 = vadd.s32 8, %v123_v1 }
  0x10   : > { %v144_v21 = vsel %vm142_vm0, %v120_v15, 0  ;;  %v147_v22 = vsel %vm142_vm0, %v121_v16, 0 }
  0x11   : > { %vm906_vm1 = vcmp.eq.s32.totalorder %v126_v3, %v129_v4  ;;  %vm910_vm2 = vcmp.eq.s32.totalorder %v125_v5, %v129_v4  ;;  %vm914_vm3 = vcmp.eq.s32.totalorder %v124_v6, %v129_v4  ;;  %vm918_vm4 = vcmp.eq.s32.totalorder %v123_v1, %v129_v4 }
  0x12   : > { %799 = vmatprep.subr.msk.mxu0 %vm906_vm1, %v883_v11  ;;  %v748_v13 = vsel %vm906_vm1, 1.0, %v884_v12  ;;  %v747_v14 = vsel %vm910_vm2, 1.0, %v884_v12  ;;  %v746_v17 = vsel %vm914_vm3, 1.0, %v884_v12  ;;  %v745_v18 = vsel %vm918_vm4, 1.0, %v884_v12 }
  0x13   : > { %800 = vmatpush3.msk.msra.mxu0 %vm906_vm1, %v883_v11  ;;  %v264_v19 = vsub.f32 %v748_v13, %v748_v13  ;;  %v271_v20 = vsub.f32 %v747_v14, %v747_v14  ;;  %v946_v23 = vand.u32 4294901760, %v144_v21  ;;  %v948_v24 = vand.u32 4294901760, %v147_v22 }
  0x14   : > { %801 = vmatprep.subr.msk.mxu0 %vm910_vm2, %v883_v11  ;;  %v278_v25 = vsub.f32 %v746_v17, %v746_v17  ;;  %v285_v26 = vsub.f32 %v745_v18, %v745_v18 }
  0x15   : > { %802 = vmatpush3.msk.msra.mxu0 %vm910_vm2, %v883_v11  ;;  %v265_v27 = vand.u32 4294901760, %v264_v19  ;;  %v272_v28 = vand.u32 4294901760, %v271_v20  ;;  %v219_v29 = vsub.f32 %v144_v21, %v946_v23  ;;  %v229_v30 = vsub.f32 %v147_v22, %v948_v24  ;;  %818 = vmatprep.mubr.f32.mxu1 %v946_v23 }
  0x16   : > { %803 = vmatprep.subr.msk.mxu0 %vm914_vm3, %v883_v11  ;;  %v279_v31 = vand.u32 4294901760, %v278_v25  ;;  %v286_v32 = vand.u32 4294901760, %v285_v26 }
  0x17   : > { %804 = vmatpush3.msk.msra.mxu0 %vm914_vm3, %v883_v11  ;;  %v266_v33 = vsub.f32 %v264_v19, %v265_v27  ;;  %v273_v34 = vsub.f32 %v271_v20, %v272_v28  ;;  %v220_v35 = vand.u32 4294901760, %v219_v29  ;;  %v230_v36 = vand.u32 4294901760, %v229_v30 }
  0x18   : > { %805 = vmatprep.subr.msk.mxu0 %vm918_vm4, %v883_v11  ;;  %v280_v37 = vsub.f32 %v278_v25, %v279_v31  ;;  %v287_v40 = vsub.f32 %v285_v26, %v286_v32 }
  0x19   : > { %v267_v38 = vand.u32 4294901760, %v266_v33  ;;  %806 = vmatpush3.msk.msra.mxu0 %vm918_vm4, %v883_v11  ;;  %v274_v39 = vand.u32 4294901760, %v273_v34  ;;  %v221_v41 = vsub.f32 %v219_v29, %v220_v35  ;;  %v231_v42 = vsub.f32 %v229_v30, %v230_v36 }
  0x1a   : > { %821 = vmatprep.subr.mxu0 %v264_v19  ;;  %v281_v43 = vand.u32 4294901760, %v280_v37  ;;  %v288_v46 = vand.u32 4294901760, %v287_v40 }
  0x1b   : > { %810 = vmatprep.subr.mxu1 %v267_v38  ;;  %v222_v44 = vand.u32 4294901760, %v221_v41  ;;  %v232_v45 = vand.u32 4294901760, %v231_v42 }
  0x1c   : > { %811 = vmatpush3.msra.mxu1 %v267_v38 }
  0x1d   : > { %812 = vmatprep.subr.mxu1 %v274_v39  ;;  %807 = vmatprep.mubr.f32.mxu0 %v222_v44 }
  0x1e   : > { %813 = vmatpush3.msra.mxu1 %v274_v39  ;;  %808 = vmatmul.mubr.f32.vlgmr.msra.gmra.mxu0 %v232_v45 }
  0x1f   : > { %814 = vmatprep.subr.mxu1 %v281_v43  ;;  %822 = vmatpush3.msra.mxu0 %v264_v19 }
  0x20   : > { %815 = vmatpush3.msra.mxu1 %v281_v43  ;;  %823 = vmatprep.subr.mxu0 %v271_v20 }
  0x21   : > { %816 = vmatprep.subr.mxu1 %v288_v46  ;;  %824 = vmatpush3.msra.mxu0 %v271_v20 }
  0x22   : > { %817 = vmatpush3.msra.mxu1 %v288_v46  ;;  %825 = vmatprep.subr.mxu0 %v278_v25 }
  0x23   : > { %819 = vmatmul.mubr.f32.vlgmr.msra.gmra.mxu1 %v948_v24  ;;  %826 = vmatpush3.msra.mxu0 %v278_v25 }
  0x24   : > { %832 = vmatprep.subr.msk.mxu1 %vm906_vm1, %v883_v11  ;;  %827 = vmatprep.subr.mxu0 %v285_v26 }
  0x25   : > { %833 = vmatpush3.msk.msra.mxu1 %vm906_vm1, %v883_v11  ;;  %828 = vmatpush3.msra.mxu0 %v285_v26 }
  0x26   : > { %829 = vmatprep.mubr.f32.mxu0 %v219_v29  ;;  %834 = vmatprep.subr.msk.mxu1 %vm910_vm2, %v883_v11 }
  0x27   : > { %830 = vmatmul.mubr.f32.vlgmr.msra.gmra.mxu0 %v229_v30  ;;  %835 = vmatpush3.msk.msra.mxu1 %vm910_vm2, %v883_v11 }
  0x28   : > { %843 = vmatprep.subr.mxu0 %v265_v27  ;;  %836 = vmatprep.subr.msk.mxu1 %vm914_vm3, %v883_v11 }
  0x29   : > { %844 = vmatpush3.msra.mxu0 %v265_v27  ;;  %837 = vmatpush3.msk.msra.mxu1 %vm914_vm3, %v883_v11 }
  0x2a   : > { %845 = vmatprep.subr.mxu0 %v272_v28  ;;  %838 = vmatprep.subr.msk.mxu1 %vm918_vm4, %v883_v11 }
  0x2b   : > { %846 = vmatpush3.msra.mxu0 %v272_v28  ;;  %839 = vmatpush3.msk.msra.mxu1 %vm918_vm4, %v883_v11 }
  0x2c   : > { %840 = vmatprep.mubr.f32.mxu1 %v220_v35  ;;  %847 = vmatprep.subr.mxu0 %v279_v31 }
  0x2d   : > { %841 = vmatmul.mubr.f32.vlgmr.msra.gmra.mxu1 %v230_v36  ;;  %848 = vmatpush3.msra.mxu0 %v279_v31 }
  0x2e   : > { %854 = vmatprep.subr.msk.mxu1 %vm906_vm1, %v883_v11  ;;  %849 = vmatprep.subr.mxu0 %v286_v32 }
  0x2f   : > { %855 = vmatpush3.msk.msra.mxu1 %vm906_vm1, %v883_v11  ;;  %850 = vmatpush3.msra.mxu0 %v286_v32 }
  0x30   : > { %851 = vmatprep.mubr.f32.mxu0 %v946_v23  ;;  %856 = vmatprep.subr.msk.mxu1 %vm910_vm2, %v883_v11 }
  0x31   : > { %852 = vmatmul.mubr.f32.vlgmr.msra.gmra.mxu0 %v948_v24  ;;  %857 = vmatpush3.msk.msra.mxu1 %vm910_vm2, %v883_v11 }
  0x32   : > { %862 = vmatprep.mubr.f32.mxu1 %v946_v23  ;;  %858 = vmatprep.subr.msk.mxu1 %vm914_vm3, %v883_v11 }
  0x33   : > { %859 = vmatpush3.msk.msra.mxu1 %vm914_vm3, %v883_v11 }
  0x34   : > { %860 = vmatprep.subr.msk.mxu1 %vm918_vm4, %v883_v11 }
  0x35   : > { %861 = vmatpush3.msk.msra.mxu1 %vm918_vm4, %v883_v11 }
  0x36   : > { %863 = vmatmul.mubr.f32.vlgmr.msra.gmra.mxu1 %v948_v24 }
  0xde   : > { %v809_v47 = vpop.f32.mrf.mxu0 }
  0xe0   : > { %v224_v49 = vpop.f32.mrf.mxu0 }
  0xe3   : > { %v820_v48 = vpop.f32.mrf.mxu1 }
  0xe4   : > { %v332_v54 = vadd.f32 %v820_v48, %v809_v47 }
  0xe5   : > { %v325_v50 = vpop.f32.mrf.mxu1 }
  0xe6   : > { %v326_v53 = vadd.f32 %v325_v50, %v224_v49 }
  0xe7   : > { %v831_v51 = vpop.f32.mrf.mxu0 }
  0xe8   : > { %v419_v59 = vadd.f32 %v831_v51, %v332_v54 }
  0xe9   : > { %v411_v55 = vpop.f32.mrf.mxu0 }
  0xea   : > { %v412_v58 = vadd.f32 %v411_v55, %v326_v53 }
  0xed   : > { %v842_v52 = vpop.f32.mrf.mxu1 }
  0xee   : > { %v504_v61 = vadd.f32 %v842_v52, %v419_v59 }
  0xef   : > { %v495_v56 = vpop.f32.mrf.mxu1 }
  0xf0   : > { %v496_v60 = vadd.f32 %v495_v56, %v412_v58 }
  0xf1   : > { %v853_v57 = vpop.f32.mrf.mxu0 }
  0xf2   : > { %v593_v1 = vadd.f32 %v853_v57, %v504_v61 }
  0xf3   : > { %v586_v62 = vpop.f32.mrf.mxu0 }
  0xf4   : > { %v587_v0 = vadd.f32 %v586_v62, %v496_v60 }
  0xf6   : > { %v864_v63 = vpop.f32.mrf.mxu1 }
  0xf7   : > { %v674_v4 = vadd.f32 %v864_v63, %v593_v1 }
  0xf8   : > { %v667_v2 = vpop.f32.mrf.mxu1 }
  0xf9   : > { %v668_v3 = vadd.f32 %v667_v2, %v587_v0  ;;  %679 = vst.msk [vmem:[%s118_s15 + $0x8] sm:$0xff] %vm677_vm5, %v674_v4 }
  0xfb   : > { %678 = vst.msk [vmem:[%s118_s15] sm:$0xff] %vm677_vm5, %v668_v3 }
  0xfc PF: > { %s11_s6 = sadd.s32 1, %s881_s6  }
  0xfd   : > { %p8_p4 = scmp.ge.s32.totalorder %s11_s6, 6  }
  0xff   :  { %10 = sbr.rel (!%p8_p4) target bundleno = 1 (0x1), region = 54 }

</bundles_post_ra>
